<compile_context>
chip_gen: v7x
topology: tpu7x:2x2x1
jax: 0.10.0
libtpu: 0.0.40
codegen_flags: <defaults>
</compile_context>

<pallas_src>
import functools

import jax
import jax.numpy as jnp
from jax.experimental import pallas as pl
from jax.experimental.pallas import tpu as pltpu

EPS = 1e-5                       # nn.LayerNorm default
_VMEM_LIMIT = 64 * 1024 * 1024   # explicit scoped-VMEM limit


def _layernorm(x, gamma, beta):
    # f32 LayerNorm (keep VPU/EUP work in f32 for v5e compatibility).
    mean = jnp.mean(x, axis=-1, keepdims=True)
    var = jnp.mean((x - mean) ** 2, axis=-1, keepdims=True)
    return (x - mean) * jax.lax.rsqrt(var + EPS) * gamma + beta


# ---------------------------------------------------------------------------
# Kernel A: ln1 + fused QKV projection, outputs head-major (B, nh, T, hs)
# ---------------------------------------------------------------------------
def qkv_kernel(x_ref, g1_ref, be1_ref, wqkv_ref, bqkv_ref,
               q_ref, k_ref, v_ref, *, n_heads, scale, matmul_dtype):
    x = x_ref[0].astype(jnp.float32)                       # (tt, E)
    tt, E = x.shape
    hs = E // n_heads

    xn = _layernorm(x, g1_ref[...], be1_ref[...])
    # One full-width (tt,E)@(E,3E) MXU matmul: bf16 feeds, f32 accumulation.
    qkv = jnp.dot(xn.astype(matmul_dtype), wqkv_ref[...],
                  preferred_element_type=jnp.float32) + bqkv_ref[...]
    # Fold 1/sqrt(hs) into q once here (amortized over the whole KV loop).
    q = qkv[:, :E] * scale
    k = qkv[:, E:2 * E]
    v = qkv[:, 2 * E:]
    # Head split happens ONCE here; for hs a multiple of 128 these slices are
    # lane-aligned and free.
    for h in range(n_heads):
        sl = slice(h * hs, (h + 1) * hs)
        q_ref[0, h] = q[:, sl].astype(q_ref.dtype)
        k_ref[0, h] = k[:, sl].astype(k_ref.dtype)
        v_ref[0, h] = v[:, sl].astype(v_ref.dtype)


# ---------------------------------------------------------------------------
# Kernel B: flash causal attention + out-proj + residual + ln2 + MLP + residual
# grid = (B, n_q_tiles, n_kv_tiles); kv axis is the "arbitrary" reduction axis
# ---------------------------------------------------------------------------
def attn_mlp_kernel(q_ref, k_ref, v_ref, x_ref,
                    wo_ref, bo_ref, g2_ref, be2_ref,
                    w1_ref, b1_ref, w2_ref, b2_ref,
                    o_ref,
                    m_scr, l_scr, acc_scr,
                    *, n_heads, t_blk, matmul_dtype, approx_recip):
    qi = pl.program_id(1)
    ki = pl.program_id(2)

    @pl.when(ki == 0)
    def _init():
        m_scr[...] = jnp.full(m_scr.shape, -jnp.inf, jnp.float32)
        l_scr[...] = jnp.zeros(l_scr.shape, jnp.float32)
        acc_scr[...] = jnp.zeros(acc_scr.shape, jnp.float32)

    def flash_step(masked):
        qh = q_ref[0]                                      # (nh, tq, hs)
        kh = k_ref[0]                                      # (nh, tk, hs)
        vh = v_ref[0]                                      # (nh, tk, hs)
        # Batched over heads: one batched MXU matmul instead of a head loop.
        s = jnp.einsum('hqd,hkd->hqk', qh, kh,
                       preferred_element_type=jnp.float32)
        if masked:
            # Diagonal tile only: local row >= local col (offsets cancel).
            r = jax.lax.broadcasted_iota(jnp.int32, (t_blk, t_blk), 0)
            c = jax.lax.broadcasted_iota(jnp.int32, (t_blk, t_blk), 1)
            s = jnp.where((r >= c)[None, :, :], s, -jnp.inf)
        m_prev = m_scr[...]
        m_new = jnp.maximum(m_prev, jnp.max(s, axis=-1, keepdims=True))
        alpha = jnp.exp(m_prev - m_new)                    # (nh, tq, 1)
        p = jnp.exp(s - m_new)                             # (nh, tq, tk)
        l_scr[...] = alpha * l_scr[...] + jnp.sum(p, axis=-1, keepdims=True)
        pv = jnp.einsum('hqk,hkd->hqd', p.astype(matmul_dtype), vh,
                        preferred_element_type=jnp.float32)
        acc_scr[...] = alpha * acc_scr[...] + pv
        m_scr[...] = m_new

    # Strictly below the diagonal: every key is visible, no masking needed.
    @pl.when(ki < qi)
    def _lower():
        flash_step(masked=False)

    # Diagonal tile: masked flash step, then finalize softmax and fuse
    # out-proj + residual1 + ln2 + MLP + residual2.  (KV tiles with ki > qi
    # are fully masked: no compute, and their DMAs are elided by the clamped
    # index_map in the wrapper.)
    @pl.when(ki == qi)
    def _diag_and_finalize():
        flash_step(masked=True)
        l = l_scr[...]
        inv_l = pl.reciprocal(l, approx=True) if approx_recip else 1.0 / l
        attn_h = acc_scr[...] * inv_l                      # (nh, tq, hs) f32
        attn = jnp.concatenate([attn_h[h] for h in range(n_heads)], axis=-1)

        x0 = x_ref[0].astype(jnp.float32)                  # (tq, E)
        a_out = jnp.dot(attn.astype(matmul_dtype), wo_ref[...],
                        preferred_element_type=jnp.float32) + bo_ref[...]
        x1 = x0 + a_out                                    # residual 1 (f32)

        xn2 = _layernorm(x1, g2_ref[...], be2_ref[...])
        h1 = jnp.dot(xn2.astype(matmul_dtype), w1_ref[...],
                     preferred_element_type=jnp.float32) + b1_ref[...]
        h1 = jnp.maximum(h1, 0.0)                          # ReLU
        h2 = jnp.dot(h1.astype(matmul_dtype), w2_ref[...],
                     preferred_element_type=jnp.float32) + b2_ref[...]
        o_ref[0] = (x1 + h2).astype(o_ref.dtype)           # residual 2


# ---------------------------------------------------------------------------
# Wrapper
# ---------------------------------------------------------------------------
def block_forward(x, params, *, n_heads, matmul_dtype=jnp.bfloat16):
    (wq, bq, wk, bk, wv, bv, wo, bo, g1, be1, g2, be2, w1, b1, w2, b2) = params
    B, T, E = x.shape
    H = w1.shape[1]
    assert E % n_heads == 0, "embed_size must be divisible by n_heads"
    hs = E // n_heads
    scale = float(hs) ** -0.5

    # Sequence tiling: pad T so tiles satisfy the (8,128) sublane constraint.
    # Zero padding is safe: padded keys are causally masked for real rows,
    # padded query rows are sliced off at the end.
    if T <= 128:
        t_blk = ((T + 7) // 8) * 8
        Tp = t_blk
    else:
        t_blk = 128
        Tp = ((T + 127) // 128) * 128
    x_p = x if Tp == T else jnp.pad(x, ((0, 0), (0, Tp - T), (0, 0)))
    n_t = Tp // t_blk

    f32 = jnp.float32
    w_item = 2 if matmul_dtype == jnp.bfloat16 else 4

    # Fused QKV weight; matmul weights fed to the MXU in bf16 (halves resident
    # weight VMEM for v7x's 64 MiB).  Biases / LN params stay f32.
    wqkv = jnp.concatenate([wq, wk, wv], axis=1).astype(matmul_dtype)
    bqkv = jnp.concatenate([bq, bk, bv], axis=1).astype(f32)
    wo_c, w1_c, w2_c = (w.astype(matmul_dtype) for w in (wo, w1, w2))
    g1_c, be1_c, g2_c, be2_c = (p.astype(f32) for p in (g1, be1, g2, be2))
    bo_c, b1_c, b2_c = (p.astype(f32) for p in (bo, b1, b2))

    # ----------------- kernel A: ln1 + QKV projection ------------------------
    qkv_cost = pl.CostEstimate(
        flops=2 * B * Tp * E * 3 * E,
        transcendentals=B * Tp,
        bytes_accessed=B * Tp * E * 4 + 3 * E * E * w_item + 3 * B * Tp * E * w_item)

    q_hm, k_hm, v_hm = pl.pallas_call(
        functools.partial(qkv_kernel, n_heads=n_heads, scale=scale,
                          matmul_dtype=matmul_dtype),
        out_shape=tuple(jax.ShapeDtypeStruct((B, n_heads, Tp, hs), matmul_dtype)
                        for _ in range(3)),
        grid_spec=pltpu.PrefetchScalarGridSpec(
            num_scalar_prefetch=0,
            grid=(B, n_t),
            in_specs=[
                pl.BlockSpec((1, t_blk, E), lambda b, t: (b, t, 0)),     # x
                pl.BlockSpec((1, E), lambda b, t: (0, 0)),               # ln1 gamma
                pl.BlockSpec((1, E), lambda b, t: (0, 0)),               # ln1 beta
                pl.BlockSpec((E, 3 * E), lambda b, t: (0, 0)),           # Wqkv
                pl.BlockSpec((1, 3 * E), lambda b, t: (0, 0)),           # bqkv
            ],
            out_specs=[pl.BlockSpec((1, n_heads, t_blk, hs),
                                    lambda b, t: (b, 0, t, 0))
                       for _ in range(3)],
        ),
        compiler_params=pltpu.CompilerParams(
            dimension_semantics=("parallel", "parallel"),
            vmem_limit_bytes=_VMEM_LIMIT),
        cost_estimate=qkv_cost,
    )(x_p, g1_c, be1_c, wqkv, bqkv)

    # --------- kernel B: flash attention + out-proj + residuals + MLP --------
    # K/V tiles strictly above the causal diagonal are never used: clamp their
    # block index to the diagonal so the pipeline sees an unchanged index and
    # elides the DMA entirely.
    kv_map = lambda b, q, k: (b, 0, jnp.minimum(k, q), 0)

    attn_cost = pl.CostEstimate(
        flops=B * (2 * Tp * Tp * E + 2 * Tp * E * E + 4 * Tp * E * H),
        transcendentals=B * n_heads * Tp * Tp // 2,
        bytes_accessed=(3 * B * Tp * E * w_item + 2 * B * Tp * E * 4
                        + (E * E + 2 * E * H) * w_item))

    out = pl.pallas_call(
        functools.partial(attn_mlp_kernel, n_heads=n_heads, t_blk=t_blk,
                          matmul_dtype=matmul_dtype,
                          approx_recip=(matmul_dtype != jnp.float32)),
        out_shape=jax.ShapeDtypeStruct((B, Tp, E), x.dtype),
        grid_spec=pltpu.PrefetchScalarGridSpec(
            num_scalar_prefetch=0,
            grid=(B, n_t, n_t),
            in_specs=[
                pl.BlockSpec((1, n_heads, t_blk, hs), lambda b, q, k: (b, 0, q, 0)),
                pl.BlockSpec((1, n_heads, t_blk, hs), kv_map),             # K
                pl.BlockSpec((1, n_heads, t_blk, hs), kv_map),             # V
                pl.BlockSpec((1, t_blk, E), lambda b, q, k: (b, q, 0)),    # x (residual)
                pl.BlockSpec((E, E), lambda b, q, k: (0, 0)),              # Wo
                pl.BlockSpec((1, E), lambda b, q, k: (0, 0)),              # bo
                pl.BlockSpec((1, E), lambda b, q, k: (0, 0)),              # ln2 gamma
                pl.BlockSpec((1, E), lambda b, q, k: (0, 0)),              # ln2 beta
                pl.BlockSpec((E, H), lambda b, q, k: (0, 0)),              # W1
                pl.BlockSpec((1, H), lambda b, q, k: (0, 0)),              # b1
                pl.BlockSpec((H, E), lambda b, q, k: (0, 0)),              # W2
                pl.BlockSpec((1, E), lambda b, q, k: (0, 0)),              # b2
            ],
            out_specs=pl.BlockSpec((1, t_blk, E), lambda b, q, k: (b, q, 0)),
            scratch_shapes=[
                pltpu.VMEM((n_heads, t_blk, 1), jnp.float32),   # running max
                pltpu.VMEM((n_heads, t_blk, 1), jnp.float32),   # running sum
                pltpu.VMEM((n_heads, t_blk, hs), jnp.float32),  # accumulator
            ],
        ),
        compiler_params=pltpu.CompilerParams(
            dimension_semantics=("parallel", "parallel", "arbitrary"),
            vmem_limit_bytes=_VMEM_LIMIT),
        cost_estimate=attn_cost,
    )(q_hm, k_hm, v_hm, x_p, wo_c, bo_c, g2_c, be2_c, w1_c, b1_c, w2_c, b2_c)

    return out if Tp == T else out[:, :T, :]


# ---------------------------------------------------------------------------
# Pure-JAX reference (matches the PyTorch Block forward)
# ---------------------------------------------------------------------------
def reference_forward(x, params, *, n_heads):
    (wq, bq, wk, bk, wv, bv, wo, bo, g1, be1, g2, be2, w1, b1, w2, b2) = params
    B, T, E = x.shape
    hs = E // n_heads

    def ln(z, g, b):
        m = jnp.mean(z, axis=-1, keepdims=True)
        v = jnp.mean((z - m) ** 2, axis=-1, keepdims=True)
        return (z - m) * jax.lax.rsqrt(v + EPS) * g + b

    xn = ln(x, g1, be1)
    q = xn @ wq + bq
    k = xn @ wk + bk
    v = xn @ wv + bv
    q = q.reshape(B, T, n_heads, hs).transpose(0, 2, 1, 3)
    k = k.reshape(B, T, n_heads, hs).transpose(0, 2, 1, 3)
    v = v.reshape(B, T, n_heads, hs).transpose(0, 2, 1, 3)
    s = jnp.einsum("bhqd,bhkd->bhqk", q, k) * (float(hs) ** -0.5)
    mask = jnp.tril(jnp.ones((T, T), bool))
    s = jnp.where(mask, s, -jnp.inf)
    p = jax.nn.softmax(s, axis=-1)
    o = jnp.einsum("bhqk,bhkd->bhqd", p, v).transpose(0, 2, 1, 3).reshape(B, T, E)
    x = x + (o @ wo + bo)
    xn2 = ln(x, g2, be2)
    x = x + (jnp.maximum(xn2 @ w1 + b1, 0.0) @ w2 + b2)
    return x


def _make_params(key, E, H):
    ks = jax.random.split(key, 12)
    init = lambda k, shape: (0.02 * jax.random.normal(k, shape)).astype(jnp.float32)
    return (
        init(ks[0], (E, E)), init(ks[1], (1, E)),    # Wq, bq
        init(ks[2], (E, E)), init(ks[3], (1, E)),    # Wk, bk
        init(ks[4], (E, E)), init(ks[5], (1, E)),    # Wv, bv
        init(ks[6], (E, E)), init(ks[7], (1, E)),    # Wo, bo
        jnp.ones((1, E), jnp.float32), jnp.zeros((1, E), jnp.float32),   # ln1
        jnp.ones((1, E), jnp.float32), jnp.zeros((1, E), jnp.float32),   # ln2
        init(ks[8], (E, H)), init(ks[9], (1, H)),    # W1, b1
        init(ks[10], (H, E)), init(ks[11], (1, E)),  # W2, b2
    )


if __name__ == "__main__":
    root = jax.random.PRNGKey(0)
    k_small, k_large, kx_small, kx_large = jax.random.split(root, 4)

    # --- Case 1: Block(embed_size=32, n_heads=4, context=8) -----------------
    B, T, E, n_heads = 2, 8, 32, 4
    params = _make_params(k_small, E, 4 * E)
    x = jax.random.normal(kx_small, (B, T, E), jnp.float32)
    ref = reference_forward(x, params, n_heads=n_heads)

    # f32 MXU feeds: tight check of the kernel logic (flash softmax, fusion).
    out_f32 = jax.block_until_ready(
        block_forward(x, params, n_heads=n_heads, matmul_dtype=jnp.float32))
    assert out_f32.shape == (B, T, E)
    assert jnp.allclose(out_f32, ref, atol=2e-4, rtol=2e-4), "f32-path mismatch"

    # Production path: bf16 MXU feeds, f32 accumulation (looser tolerance).
    out_bf16 = jax.block_until_ready(
        block_forward(x, params, n_heads=n_heads, matmul_dtype=jnp.bfloat16))
    assert out_bf16.shape == (B, T, E)
    assert jnp.allclose(out_bf16, ref, atol=1e-2, rtol=1e-2), "bf16-path mismatch"

    # --- Case 2: multi-tile sequence (exercises below/diag branches and the
    # clamped KV index_map) ----------------------------------------------------
    B2, T2, E2, n_heads2 = 1, 256, 128, 4
    params2 = _make_params(k_large, E2, 4 * E2)
    x2 = jax.random.normal(kx_large, (B2, T2, E2), jnp.float32)
    ref2 = reference_forward(x2, params2, n_heads=n_heads2)
    out2 = jax.block_until_ready(
        block_forward(x2, params2, n_heads=n_heads2, matmul_dtype=jnp.bfloat16))
    assert out2.shape == (B2, T2, E2)
    assert jnp.max(jnp.abs(out2 - ref2)) < 2e-2, "multi-tile bf16 mismatch"

    print("KERNEL_OK")
</pallas_src>

<mosaic_0001>
module attributes {stable_mosaic.version = 11 : i64} {
  func.func @qkv_kernel(%arg0: i32, %arg1: i32, %arg2: memref<1x8x32xf32, #tpu.memory_space<vmem>>, %arg3: memref<1x32xf32, #tpu.memory_space<vmem>>, %arg4: memref<1x32xf32, #tpu.memory_space<vmem>>, %arg5: memref<32x96xf32, #tpu.memory_space<vmem>>, %arg6: memref<1x96xf32, #tpu.memory_space<vmem>>, %arg7: memref<1x4x8x8xf32, #tpu.memory_space<vmem>>, %arg8: memref<1x4x8x8xf32, #tpu.memory_space<vmem>>, %arg9: memref<1x4x8x8xf32, #tpu.memory_space<vmem>>) attributes {dimension_semantics = [#tpu.dimension_semantics<parallel>, #tpu.dimension_semantics<parallel>], iteration_bounds = array<i64: 2, 1>, scalar_prefetch = 0 : i64, scratch_operands = 0 : i64, tpu.core_type = #tpu.core_type<tc>, window_params = [{transform_indices = @transform_0, window_bounds = array<i64: 1, 8, 32>}, {pipeline_mode = #tpu.pipeline_mode<synchronous>, transform_indices = @transform_1, window_bounds = array<i64: 1, 32>}, {pipeline_mode = #tpu.pipeline_mode<synchronous>, transform_indices = @transform_2, window_bounds = array<i64: 1, 32>}, {pipeline_mode = #tpu.pipeline_mode<synchronous>, transform_indices = @transform_3, window_bounds = array<i64: 32, 96>}, {pipeline_mode = #tpu.pipeline_mode<synchronous>, transform_indices = @transform_4, window_bounds = array<i64: 1, 96>}, {transform_indices = @transform_5, window_bounds = array<i64: 1, 4, 8, 8>}, {transform_indices = @transform_6, window_bounds = array<i64: 1, 4, 8, 8>}, {transform_indices = @transform_7, window_bounds = array<i64: 1, 4, 8, 8>}]} {
    %c0 = arith.constant 0 : index
    %c0_0 = arith.constant 0 : index
    %c0_1 = arith.constant 0 : index
    %0 = vector.load %arg2[%c0, %c0_0, %c0_1] : memref<1x8x32xf32, #tpu.memory_space<vmem>>, vector<1x8x32xf32>
    %1 = vector.shape_cast %0 : vector<1x8x32xf32> to vector<8x32xf32>
    %c0_2 = arith.constant 0 : index
    %c0_3 = arith.constant 0 : index
    %2 = vector.load %arg3[%c0_2, %c0_3] : memref<1x32xf32, #tpu.memory_space<vmem>>, vector<1x32xf32>
    %c0_4 = arith.constant 0 : index
    %c0_5 = arith.constant 0 : index
    %3 = vector.load %arg4[%c0_4, %c0_5] : memref<1x32xf32, #tpu.memory_space<vmem>>, vector<1x32xf32>
    %cst = arith.constant dense<0.000000e+00> : vector<8xf32>
    %4 = vector.multi_reduction <add>, %1, %cst [1] : vector<8x32xf32> to vector<8xf32>
    %5 = vector.shape_cast %4 : vector<8xf32> to vector<8x1xf32>
    %cst_6 = arith.constant 3.200000e+01 : f32
    %6 = vector.broadcast %cst_6 : f32 to vector<8x1xf32>
    %7 = arith.divf %5, %6 : vector<8x1xf32>
    %8 = vector.broadcast %7 : vector<8x1xf32> to vector<8x32xf32>
    %9 = arith.subf %1, %8 : vector<8x32xf32>
    %10 = arith.mulf %9, %9 : vector<8x32xf32>
    %cst_7 = arith.constant dense<0.000000e+00> : vector<8xf32>
    %11 = vector.multi_reduction <add>, %10, %cst_7 [1] : vector<8x32xf32> to vector<8xf32>
    %12 = vector.shape_cast %11 : vector<8xf32> to vector<8x1xf32>
    %cst_8 = arith.constant 3.200000e+01 : f32
    %13 = vector.broadcast %cst_8 : f32 to vector<8x1xf32>
    %14 = arith.divf %12, %13 : vector<8x1xf32>
    %15 = vector.broadcast %7 : vector<8x1xf32> to vector<8x32xf32>
    %16 = arith.subf %1, %15 : vector<8x32xf32>
    %cst_9 = arith.constant 9.99999974E-6 : f32
    %17 = vector.broadcast %cst_9 : f32 to vector<8x1xf32>
    %18 = arith.addf %14, %17 : vector<8x1xf32>
    %19 = math.rsqrt %18 : vector<8x1xf32>
    %20 = vector.broadcast %19 : vector<8x1xf32> to vector<8x32xf32>
    %21 = arith.mulf %16, %20 : vector<8x32xf32>
    %22 = vector.broadcast %2 : vector<1x32xf32> to vector<8x32xf32>
    %23 = arith.mulf %21, %22 : vector<8x32xf32>
    %24 = vector.broadcast %3 : vector<1x32xf32> to vector<8x32xf32>
    %25 = arith.addf %23, %24 : vector<8x32xf32>
    %c0_10 = arith.constant 0 : index
    %c0_11 = arith.constant 0 : index
    %26 = vector.load %arg5[%c0_10, %c0_11] : memref<32x96xf32, #tpu.memory_space<vmem>>, vector<32x96xf32>
    %cst_12 = arith.constant dense<0.000000e+00> : vector<8x96xf32>
    %27 = tpu.matmul %25, %26, %cst_12 {dimension_numbers = #tpu.dot_dimension_numbers<[1], [0], [0], [1], [0, 0, 1, 1], [], []>} : vector<8x32xf32>, vector<32x96xf32>, vector<8x96xf32> -> vector<8x96xf32>
    %c0_13 = arith.constant 0 : index
    %c0_14 = arith.constant 0 : index
    %28 = vector.load %arg6[%c0_13, %c0_14] : memref<1x96xf32, #tpu.memory_space<vmem>>, vector<1x96xf32>
    %29 = vector.broadcast %28 : vector<1x96xf32> to vector<8x96xf32>
    %30 = arith.addf %27, %29 : vector<8x96xf32>
    %31 = vector.extract_strided_slice %30 {offsets = [0, 0], sizes = [8, 32], strides = [1, 1]} : vector<8x96xf32> to vector<8x32xf32>
    %cst_15 = arith.constant 0.353553385 : f32
    %32 = vector.broadcast %cst_15 : f32 to vector<8x32xf32>
    %33 = arith.mulf %31, %32 : vector<8x32xf32>
    %34 = vector.extract_strided_slice %30 {offsets = [0, 32], sizes = [8, 32], strides = [1, 1]} : vector<8x96xf32> to vector<8x32xf32>
    %35 = vector.extract_strided_slice %30 {offsets = [0, 64], sizes = [8, 32], strides = [1, 1]} : vector<8x96xf32> to vector<8x32xf32>
    %36 = vector.extract_strided_slice %33 {offsets = [0, 0], sizes = [8, 8], strides = [1, 1]} : vector<8x32xf32> to vector<8x8xf32>
    %c0_16 = arith.constant 0 : index
    %c0_17 = arith.constant 0 : index
    %c0_18 = arith.constant 0 : index
    %c0_19 = arith.constant 0 : index
    %37 = vector.load %arg7[%c0_16, %c0_17, %c0_18, %c0_19] : memref<1x4x8x8xf32, #tpu.memory_space<vmem>>, vector<1x1x8x8xf32>
    %38 = vector.shape_cast %37 : vector<1x1x8x8xf32> to vector<8x8xf32>
    %39 = vector.shape_cast %36 : vector<8x8xf32> to vector<1x1x8x8xf32>
    tpu.vector_store %arg7[%c0_16, %c0_17, %c0_18, %c0_19], %39 {strides = array<i32>} : memref<1x4x8x8xf32, #tpu.memory_space<vmem>>, vector<1x1x8x8xf32>,
    %40 = vector.extract_strided_slice %34 {offsets = [0, 0], sizes = [8, 8], strides = [1, 1]} : vector<8x32xf32> to vector<8x8xf32>
    %c0_20 = arith.constant 0 : index
    %c0_21 = arith.constant 0 : index
    %c0_22 = arith.constant 0 : index
    %c0_23 = arith.constant 0 : index
    %41 = vector.load %arg8[%c0_20, %c0_21, %c0_22, %c0_23] : memref<1x4x8x8xf32, #tpu.memory_space<vmem>>, vector<1x1x8x8xf32>
    %42 = vector.shape_cast %41 : vector<1x1x8x8xf32> to vector<8x8xf32>
    %43 = vector.shape_cast %40 : vector<8x8xf32> to vector<1x1x8x8xf32>
    tpu.vector_store %arg8[%c0_20, %c0_21, %c0_22, %c0_23], %43 {strides = array<i32>} : memref<1x4x8x8xf32, #tpu.memory_space<vmem>>, vector<1x1x8x8xf32>,
    %44 = vector.extract_strided_slice %35 {offsets = [0, 0], sizes = [8, 8], strides = [1, 1]} : vector<8x32xf32> to vector<8x8xf32>
    %c0_24 = arith.constant 0 : index
    %c0_25 = arith.constant 0 : index
    %c0_26 = arith.constant 0 : index
    %c0_27 = arith.constant 0 : index
    %45 = vector.load %arg9[%c0_24, %c0_25, %c0_26, %c0_27] : memref<1x4x8x8xf32, #tpu.memory_space<vmem>>, vector<1x1x8x8xf32>
    %46 = vector.shape_cast %45 : vector<1x1x8x8xf32> to vector<8x8xf32>
    %47 = vector.shape_cast %44 : vector<8x8xf32> to vector<1x1x8x8xf32>
    tpu.vector_store %arg9[%c0_24, %c0_25, %c0_26, %c0_27], %47 {strides = array<i32>} : memref<1x4x8x8xf32, #tpu.memory_space<vmem>>, vector<1x1x8x8xf32>,
    %48 = vector.extract_strided_slice %33 {offsets = [0, 8], sizes = [8, 8], strides = [1, 1]} : vector<8x32xf32> to vector<8x8xf32>
    %c0_28 = arith.constant 0 : index
    %c1 = arith.constant 1 : index
    %c0_29 = arith.constant 0 : index
    %c0_30 = arith.constant 0 : index
    %49 = vector.load %arg7[%c0_28, %c1, %c0_29, %c0_30] : memref<1x4x8x8xf32, #tpu.memory_space<vmem>>, vector<1x1x8x8xf32>
    %50 = vector.shape_cast %49 : vector<1x1x8x8xf32> to vector<8x8xf32>
    %51 = vector.shape_cast %48 : vector<8x8xf32> to vector<1x1x8x8xf32>
    tpu.vector_store %arg7[%c0_28, %c1, %c0_29, %c0_30], %51 {strides = array<i32>} : memref<1x4x8x8xf32, #tpu.memory_space<vmem>>, vector<1x1x8x8xf32>,
    %52 = vector.extract_strided_slice %34 {offsets = [0, 8], sizes = [8, 8], strides = [1, 1]} : vector<8x32xf32> to vector<8x8xf32>
    %c0_31 = arith.constant 0 : index
    %c1_32 = arith.constant 1 : index
    %c0_33 = arith.constant 0 : index
    %c0_34 = arith.constant 0 : index
    %53 = vector.load %arg8[%c0_31, %c1_32, %c0_33, %c0_34] : memref<1x4x8x8xf32, #tpu.memory_space<vmem>>, vector<1x1x8x8xf32>
    %54 = vector.shape_cast %53 : vector<1x1x8x8xf32> to vector<8x8xf32>
    %55 = vector.shape_cast %52 : vector<8x8xf32> to vector<1x1x8x8xf32>
    tpu.vector_store %arg8[%c0_31, %c1_32, %c0_33, %c0_34], %55 {strides = array<i32>} : memref<1x4x8x8xf32, #tpu.memory_space<vmem>>, vector<1x1x8x8xf32>,
    %56 = vector.extract_strided_slice %35 {offsets = [0, 8], sizes = [8, 8], strides = [1, 1]} : vector<8x32xf32> to vector<8x8xf32>
    %c0_35 = arith.constant 0 : index
    %c1_36 = arith.constant 1 : index
    %c0_37 = arith.constant 0 : index
    %c0_38 = arith.constant 0 : index
    %57 = vector.load %arg9[%c0_35, %c1_36, %c0_37, %c0_38] : memref<1x4x8x8xf32, #tpu.memory_space<vmem>>, vector<1x1x8x8xf32>
    %58 = vector.shape_cast %57 : vector<1x1x8x8xf32> to vector<8x8xf32>
    %59 = vector.shape_cast %56 : vector<8x8xf32> to vector<1x1x8x8xf32>
    tpu.vector_store %arg9[%c0_35, %c1_36, %c0_37, %c0_38], %59 {strides = array<i32>} : memref<1x4x8x8xf32, #tpu.memory_space<vmem>>, vector<1x1x8x8xf32>,
    %60 = vector.extract_strided_slice %33 {offsets = [0, 16], sizes = [8, 8], strides = [1, 1]} : vector<8x32xf32> to vector<8x8xf32>
    %c0_39 = arith.constant 0 : index
    %c2 = arith.constant 2 : index
    %c0_40 = arith.constant 0 : index
    %c0_41 = arith.constant 0 : index
    %61 = vector.load %arg7[%c0_39, %c2, %c0_40, %c0_41] : memref<1x4x8x8xf32, #tpu.memory_space<vmem>>, vector<1x1x8x8xf32>
    %62 = vector.shape_cast %61 : vector<1x1x8x8xf32> to vector<8x8xf32>
    %63 = vector.shape_cast %60 : vector<8x8xf32> to vector<1x1x8x8xf32>
    tpu.vector_store %arg7[%c0_39, %c2, %c0_40, %c0_41], %63 {strides = array<i32>} : memref<1x4x8x8xf32, #tpu.memory_space<vmem>>, vector<1x1x8x8xf32>,
    %64 = vector.extract_strided_slice %34 {offsets = [0, 16], sizes = [8, 8], strides = [1, 1]} : vector<8x32xf32> to vector<8x8xf32>
    %c0_42 = arith.constant 0 : index
    %c2_43 = arith.constant 2 : index
    %c0_44 = arith.constant 0 : index
    %c0_45 = arith.constant 0 : index
    %65 = vector.load %arg8[%c0_42, %c2_43, %c0_44, %c0_45] : memref<1x4x8x8xf32, #tpu.memory_space<vmem>>, vector<1x1x8x8xf32>
    %66 = vector.shape_cast %65 : vector<1x1x8x8xf32> to vector<8x8xf32>
    %67 = vector.shape_cast %64 : vector<8x8xf32> to vector<1x1x8x8xf32>
    tpu.vector_store %arg8[%c0_42, %c2_43, %c0_44, %c0_45], %67 {strides = array<i32>} : memref<1x4x8x8xf32, #tpu.memory_space<vmem>>, vector<1x1x8x8xf32>,
    %68 = vector.extract_strided_slice %35 {offsets = [0, 16], sizes = [8, 8], strides = [1, 1]} : vector<8x32xf32> to vector<8x8xf32>
    %c0_46 = arith.constant 0 : index
    %c2_47 = arith.constant 2 : index
    %c0_48 = arith.constant 0 : index
    %c0_49 = arith.constant 0 : index
    %69 = vector.load %arg9[%c0_46, %c2_47, %c0_48, %c0_49] : memref<1x4x8x8xf32, #tpu.memory_space<vmem>>, vector<1x1x8x8xf32>
    %70 = vector.shape_cast %69 : vector<1x1x8x8xf32> to vector<8x8xf32>
    %71 = vector.shape_cast %68 : vector<8x8xf32> to vector<1x1x8x8xf32>
    tpu.vector_store %arg9[%c0_46, %c2_47, %c0_48, %c0_49], %71 {strides = array<i32>} : memref<1x4x8x8xf32, #tpu.memory_space<vmem>>, vector<1x1x8x8xf32>,
    %72 = vector.extract_strided_slice %33 {offsets = [0, 24], sizes = [8, 8], strides = [1, 1]} : vector<8x32xf32> to vector<8x8xf32>
    %c0_50 = arith.constant 0 : index
    %c3 = arith.constant 3 : index
    %c0_51 = arith.constant 0 : index
    %c0_52 = arith.constant 0 : index
    %73 = vector.load %arg7[%c0_50, %c3, %c0_51, %c0_52] : memref<1x4x8x8xf32, #tpu.memory_space<vmem>>, vector<1x1x8x8xf32>
    %74 = vector.shape_cast %73 : vector<1x1x8x8xf32> to vector<8x8xf32>
    %75 = vector.shape_cast %72 : vector<8x8xf32> to vector<1x1x8x8xf32>
    tpu.vector_store %arg7[%c0_50, %c3, %c0_51, %c0_52], %75 {strides = array<i32>} : memref<1x4x8x8xf32, #tpu.memory_space<vmem>>, vector<1x1x8x8xf32>,
    %76 = vector.extract_strided_slice %34 {offsets = [0, 24], sizes = [8, 8], strides = [1, 1]} : vector<8x32xf32> to vector<8x8xf32>
    %c0_53 = arith.constant 0 : index
    %c3_54 = arith.constant 3 : index
    %c0_55 = arith.constant 0 : index
    %c0_56 = arith.constant 0 : index
    %77 = vector.load %arg8[%c0_53, %c3_54, %c0_55, %c0_56] : memref<1x4x8x8xf32, #tpu.memory_space<vmem>>, vector<1x1x8x8xf32>
    %78 = vector.shape_cast %77 : vector<1x1x8x8xf32> to vector<8x8xf32>
    %79 = vector.shape_cast %76 : vector<8x8xf32> to vector<1x1x8x8xf32>
    tpu.vector_store %arg8[%c0_53, %c3_54, %c0_55, %c0_56], %79 {strides = array<i32>} : memref<1x4x8x8xf32, #tpu.memory_space<vmem>>, vector<1x1x8x8xf32>,
    %80 = vector.extract_strided_slice %35 {offsets = [0, 24], sizes = [8, 8], strides = [1, 1]} : vector<8x32xf32> to vector<8x8xf32>
    %c0_57 = arith.constant 0 : index
    %c3_58 = arith.constant 3 : index
    %c0_59 = arith.constant 0 : index
    %c0_60 = arith.constant 0 : index
    %81 = vector.load %arg9[%c0_57, %c3_58, %c0_59, %c0_60] : memref<1x4x8x8xf32, #tpu.memory_space<vmem>>, vector<1x1x8x8xf32>
    %82 = vector.shape_cast %81 : vector<1x1x8x8xf32> to vector<8x8xf32>
    %83 = vector.shape_cast %80 : vector<8x8xf32> to vector<1x1x8x8xf32>
    tpu.vector_store %arg9[%c0_57, %c3_58, %c0_59, %c0_60], %83 {strides = array<i32>} : memref<1x4x8x8xf32, #tpu.memory_space<vmem>>, vector<1x1x8x8xf32>,
    return
  }
  func.func @transform_0(%arg0: i32, %arg1: i32) -> (i32, i32, i32) {
    %c0_i32 = arith.constant 0 : i32
    %c0_i32_0 = arith.constant 0 : i32
    return %arg0, %arg1, %c0_i32 : i32, i32, i32
  }
  func.func @transform_1(%arg0: i32, %arg1: i32) -> (i32, i32) {
    %c0_i32 = arith.constant 0 : i32
    %c0_i32_0 = arith.constant 0 : i32
    %c0_i32_1 = arith.constant 0 : i32
    return %c0_i32, %c0_i32_0 : i32, i32
  }
  func.func @transform_2(%arg0: i32, %arg1: i32) -> (i32, i32) {
    %c0_i32 = arith.constant 0 : i32
    %c0_i32_0 = arith.constant 0 : i32
    %c0_i32_1 = arith.constant 0 : i32
    return %c0_i32, %c0_i32_0 : i32, i32
  }
  func.func @transform_3(%arg0: i32, %arg1: i32) -> (i32, i32) {
    %c0_i32 = arith.constant 0 : i32
    %c0_i32_0 = arith.constant 0 : i32
    %c0_i32_1 = arith.constant 0 : i32
    return %c0_i32, %c0_i32_0 : i32, i32
  }
  func.func @transform_4(%arg0: i32, %arg1: i32) -> (i32, i32) {
    %c0_i32 = arith.constant 0 : i32
    %c0_i32_0 = arith.constant 0 : i32
    %c0_i32_1 = arith.constant 0 : i32
    return %c0_i32, %c0_i32_0 : i32, i32
  }
  func.func @transform_5(%arg0: i32, %arg1: i32) -> (i32, i32, i32, i32) {
    %c0_i32 = arith.constant 0 : i32
    %c0_i32_0 = arith.constant 0 : i32
    %c0_i32_1 = arith.constant 0 : i32
    return %arg0, %c0_i32, %arg1, %c0_i32_0 : i32, i32, i32, i32
  }
  func.func @transform_6(%arg0: i32, %arg1: i32) -> (i32, i32, i32, i32) {
    %c0_i32 = arith.constant 0 : i32
    %c0_i32_0 = arith.constant 0 : i32
    %c0_i32_1 = arith.constant 0 : i32
    return %arg0, %c0_i32, %arg1, %c0_i32_0 : i32, i32, i32, i32
  }
  func.func @transform_7(%arg0: i32, %arg1: i32) -> (i32, i32, i32, i32) {
    %c0_i32 = arith.constant 0 : i32
    %c0_i32_0 = arith.constant 0 : i32
    %c0_i32_1 = arith.constant 0 : i32
    return %arg0, %c0_i32, %arg1, %c0_i32_0 : i32, i32, i32, i32
  }
}

</mosaic_0001>

<bundles_post_ra>
// kernel: tpu_custom_call.1
= control target key start
LH: loop header
LB: loop body
LE: loop exit
PB: predicated region body
PF: predicated region fallthrough
CT: control target
= control target key end

     0   :  { %s1768_s0 = inlined_call_operand.hbm [shape: f32[2,8,32], index: 0, kind: input, shape index: {}]   ;;  %s1769_s1 = inlined_call_operand.hbm [shape: f32[1,32], index: 1, kind: input, shape index: {}]   ;;  %s1770_s2 = inlined_call_operand.hbm [shape: f32[1,32], index: 2, kind: input, shape index: {}]   ;;  %s1771_s3 = inlined_call_operand.hbm [shape: f32[32,96], index: 3, kind: input, shape index: {}]   ;;  %s1772_s4 = inlined_call_operand.hbm [shape: f32[1,96], index: 4, kind: input, shape index: {}]   ;;  %s1773_s5 = inlined_call_operand.hbm [shape: f32[2,4,8,8], index: 5, kind: output, shape index: {0}]   ;;  %s1774_s6 = inlined_call_operand.hbm [shape: f32[2,4,8,8], index: 6, kind: output, shape index: {1}]   ;;  %s1775_s7 = inlined_call_operand.hbm [shape: f32[2,4,8,8], index: 7, kind: output, shape index: {2}]  }
   0x1   :  { %1782 = sst [smem:[#allocation20_spill]] %s1769_s1 }
   0x2   :  { %1783 = sst [smem:[#allocation21_spill]] %s1770_s2 }
   0x3   :  { %13 = vsyncpa [#allocation3], 0 }
   0x4   :  { %15 = vsyncpa [#allocation3 + $0x1], 0 }
   0x5   :  { %16 = vsyncpa [#allocation6], 0 }
   0x6   :  { %17 = vsyncpa [#allocation9], 0 }
   0x7   :  { %18 = vsyncpa [#allocation4], 0 }
   0x8   :  { %20 = vsyncpa [#allocation4 + $0x1], 0 }
   0x9   :  { %21 = vsyncpa [#allocation13], 0 }
   0xa   :  { %23 = vsyncpa [#allocation13 + $0x1], 0  ;;  %s1366_s24 = smov 0   ;;  %s1368_s25 = smov 0  }
   0xb   :  { %s1370_s26 = smov 0   ;;  %s1372_s27 = smov 0  }
   0xc   :  { %s1374_s28 = smov 0   ;;  %s1376_s29 = smov 0  }
   0xd LB: > { %s1397_s30 = sadd.s32 4294967295, %s1298_s29   ;;  %p807_p0 = scmp.ge.s32.totalorder %s1298_s29, 1  ;;  %s1298_s29 = sphi %s1376_s29, %s29_s29   ;;  %s1294_s28 = sphi %s1374_s28, %s1810_s28   ;;  %s1290_s27 = sphi %s1372_s27, %s1809_s27   ;;  %s1286_s26 = sphi %s1370_s26, %s1808_s26   ;;  %s1282_s25 = sphi %s1368_s25, %s1807_s25   ;;  %s1278_s24 = sphi %s1366_s24, %s1806_s24  }
   0xe   : > { %p1776_p1 = scmp.eq.s32.totalorder %s1397_s30, 0  ;;  %p242_p2 = scmp.lt.s32.totalorder %s1298_s29, 3 }
   0xf   : > { %s1300_s9 = smov [#allocation5]   ;;  %s1301_s11 = smov [#allocation8]  }
  0x10   : > { %p1402_p3 = pnand %p807_p0, %p242_p2  ;;  %s255_s10 = sshll.u32 %s1300_s9, 4  ;;  %s256_s10 = int_to_ptr.vmem [resolvable:$true] %s255_s10 }
  0x11   : > { %s276_s12 = sshll.u32 %s1301_s11, 4  ;;  %s1302_s14 = smov [#allocation7]   ;;  %s1415_s12 = int_to_ptr.vmem [resolvable:$true] %s276_s12 }
  0x12   : > { %s1784_s8 = scalar_select %p1402_p3, 1, 0 }
  0x13   : > { %p897_p5 = pneg %p1402_p3  ;;  %s1417_s15 = sshll.u32 %s1302_s14, 4  ;;  %s267_s15 = int_to_ptr.vmem [resolvable:$true] %s1417_s15 }
  0x14   : > { %s1786_s1 = sld [smem:[#allocation20_spill]] }
  0x15   : > { %p1411_p6 = pnand %p897_p5, %p1776_p1 }
  0x17   : > { %p1427_p8 = pneg %p1411_p6 }
  0x1a   : > { %s1006_s18 = scalar_lea.hbm %s1786_s1, 16 }
  0x1b   : > { %p1007_p7 = scmp.ne.s32.totalorder %s1786_s1, %s1006_s18  ;;  %p1013_p11 = scmp.lt.u32.totalorder %s1006_s18, %s1786_s1 }
  0x1d   : > { %p1009_p9 = pnand %p1427_p8, %p1007_p7 }
  0x1f   : > { %p1010_p10 = pneg %p1009_p9 }
  0x21   : > { %p1015_p12 = pnand %p1013_p11, %p1010_p10 }
  0x23   : > { %1018 = shalt.err (!%p1015_p12)
}
  0x24   : > { %s1019_s9 = scalar_lea.vmem %s256_s10, 16  ;;  %s1026_s11 = scalar_lea.vmem %s256_s10, 32 }
  0x25   : > { %p1020_p13 = scmp.ne.s32.totalorder %s256_s10, %s1019_s9  ;;  %p1027_p5 = scmp.lt.s32.totalorder %s256_s10, %s256_s10 }
  0x26   : > { %p1028_p4 = scmp.lt.s32.totalorder %s1026_s11, %s1019_s9 }
  0x27   : > { %p1022_p0 = pnand %p1020_p13, %p1427_p8 }
  0x28   : > { %p1029_p1 = por %p1028_p4, %p1027_p5 }
  0x29   : > { %p1023_p2 = pneg %p1022_p0 }
  0x2b   : > { %p1030_p3 = pnand %p1029_p1, %p1023_p2 }
  0x2d   : > { %1033 = shalt.err (!%p1030_p3)
}
  0x2e   : > { %900 = dma.hbm_to_vmem [thread:$0]  (!%p1411_p6), %s1786_s1, 16, %s256_s10, [#allocation6]  }
  0x2f   : > { %s1034_s19 = scalar_lea.hbm %s1771_s3, 512 }
  0x30   : > { %p1035_p7 = scmp.ne.s32.totalorder %s1771_s3, %s1034_s19  ;;  %p1041_p1 = scmp.lt.u32.totalorder %s1034_s19, %s1771_s3 }
  0x32   : > { %p1037_p9 = pnand %p1035_p7, %p1427_p8 }
  0x34   : > { %p1038_p4 = pneg %p1037_p9 }
  0x36   : > { %p1043_p3 = pnand %p1041_p1, %p1038_p4 }
  0x38   : > { %1046 = shalt.err (!%p1043_p3)
}
  0x39   : > { %s1047_s10 = scalar_lea.vmem %s1415_s12, 512  ;;  %p1055_p13 = scmp.lt.s32.totalorder %s1415_s12, %s1415_s12 }
  0x3a   : > { %p1048_p10 = scmp.ne.s32.totalorder %s1415_s12, %s1047_s10  ;;  %p1056_p0 = scmp.lt.s32.totalorder %s1047_s10, %s1047_s10 }
  0x3c   : > { %p1050_p11 = pnand %p1048_p10, %p1427_p8  ;;  %p1057_p2 = por %p1056_p0, %p1055_p13 }
  0x3e   : > { %p1051_p12 = pneg %p1050_p11 }
  0x40   : > { %p1058_p5 = pnand %p1057_p2, %p1051_p12 }
  0x42   : > { %1061 = shalt.err (!%p1058_p5)
}
  0x43   : > { %s1303_s11 = smov 128   ;;  %s1304_s14 = smov 8  }
  0x44   : > { %906 = dma.hbm_to_vmem [thread:$0]  (!%p1411_p6), %s1771_s3, 512, %s1415_s12, [#allocation9], %s1303_s11, %s1303_s11, %s1304_s14  }
  0x45   : > { %s1788_s2 = sld [smem:[#allocation21_spill]] }
  0x4b   : > { %s1062_s20 = scalar_lea.hbm %s1788_s2, 16 }
  0x4c   : > { %p1063_p7 = scmp.ne.s32.totalorder %s1788_s2, %s1062_s20  ;;  %p1069_p1 = scmp.lt.u32.totalorder %s1062_s20, %s1788_s2 }
  0x4e   : > { %p1065_p9 = pnand %p1063_p7, %p1427_p8 }
  0x50   : > { %p1066_p4 = pneg %p1065_p9 }
  0x52   : > { %p1071_p3 = pnand %p1069_p1, %p1066_p4 }
  0x54   : > { %1074 = shalt.err (!%p1071_p3)
}
  0x55   : > { %s1075_s16 = scalar_lea.vmem %s267_s15, 16  ;;  %s1082_s12 = scalar_lea.vmem %s267_s15, 32 }
  0x56   : > { %p1076_p10 = scmp.ne.s32.totalorder %s267_s15, %s1075_s16  ;;  %p1083_p13 = scmp.lt.s32.totalorder %s267_s15, %s267_s15 }
  0x57   : > { %p1084_p0 = scmp.lt.s32.totalorder %s1082_s12, %s1075_s16 }
  0x58   : > { %p1078_p11 = pnand %p1076_p10, %p1427_p8 }
  0x59   : > { %p1085_p2 = por %p1084_p0, %p1083_p13 }
  0x5a   : > { %p1079_p12 = pneg %p1078_p11 }
  0x5c   : > { %p1086_p5 = pnand %p1085_p2, %p1079_p12 }
  0x5e   : > { %1089 = shalt.err (!%p1086_p5)
}
  0x5f   : > { %903 = dma.hbm_to_vmem [thread:$0]  (!%p1411_p6), %s1788_s2, 16, %s267_s15, [#allocation6]  }
  0x60   : > { %s1305_s17 = smov [#allocation10]   ;;  %s1090_s22 = scalar_lea.hbm %s1772_s4, 16 }
  0x61   : > { %s290_s18 = sshll.u32 %s1305_s17, 4  ;;  %p1091_p7 = scmp.ne.s32.totalorder %s1772_s4, %s1090_s22  ;;  %s291_s18 = int_to_ptr.vmem [resolvable:$true] %s290_s18 }
  0x62   : > { %p1097_p1 = scmp.lt.u32.totalorder %s1090_s22, %s1772_s4 }
  0x63   : > { %p1093_p9 = pnand %p1091_p7, %p1427_p8 }
  0x65   : > { %p1094_p4 = pneg %p1093_p9 }
  0x67   : > { %p1099_p3 = pnand %p1097_p1, %p1094_p4 }
  0x69   : > { %1102 = shalt.err (!%p1099_p3)
}
  0x6a   : > { %s1103_s15 = scalar_lea.vmem %s291_s18, 16  ;;  %s1110_s12 = scalar_lea.vmem %s291_s18, 32 }
  0x6b   : > { %p1104_p10 = scmp.ne.s32.totalorder %s291_s18, %s1103_s15  ;;  %p1111_p13 = scmp.lt.s32.totalorder %s291_s18, %s291_s18 }
  0x6c   : > { %p1112_p0 = scmp.lt.s32.totalorder %s1110_s12, %s1103_s15 }
  0x6d   : > { %p1106_p11 = pnand %p1104_p10, %p1427_p8 }
  0x6e   : > { %p1113_p2 = por %p1112_p0, %p1111_p13 }
  0x6f   : > { %p1107_p12 = pneg %p1106_p11 }
  0x71   : > { %p1114_p5 = pnand %p1113_p2, %p1107_p12 }
  0x73   : > { %1117 = shalt.err (!%p1114_p5)
}
  0x74   : > { %909 = dma.hbm_to_vmem [thread:$0]  (!%p1411_p6), %s1772_s4, 16, %s291_s18, [#allocation9]  }
  0x75   : > { %s1778_s21 = sadd.s32 4294967294, %s1298_s29   ;;  %s41_s17 = sadd.s32 1, %s1294_s28 }
  0x76   : > { %p43_p8 = scmp.ge.s32.totalorder %s41_s17, 2  ;;  %s50_s13 = sadd.s32 1, %s1286_s26 }
  0x77   : > { %p57_p7 = scmp.ne.s32.totalorder %s1286_s26, %s1282_s25  ;;  %p58_p9 = scmp.eq.s32.totalorder %s1298_s29, 0 }
  0x78   : > { %s1812_s17 = smov (%p43_p8, %s41_s17), 0  ;;  %p63_p1 = scmp.ne.s32.totalorder %s1282_s25, %s1278_s24 }
  0x79   : > { %p1511_p4 = por %p58_p9, %p57_p7  ;;  %s45_s18 = ssub.s32 %s1294_s28, %s1812_s17 }
  0x7a   : > { %p173_p6 = scmp.eq.s32.totalorder %s1397_s30, 1  ;;  %p48_p3 = scmp.eq.s32.totalorder %s45_s18, 0 }
  0x7b   : > { %p1790_p10 = scmp.eq.s32.totalorder %s1397_s30, 0  ;;  %p179_p13 = scmp.eq.s32.totalorder %s1778_s21, 1 }
  0x7c   : > { %p1526_p12 = por %p173_p6, %p57_p7  ;;  %p928_p2 = scmp.lt.s32.totalorder %s1298_s29, 2 }
  0x7d   : > { %p1522_p11 = por %p1790_p10, %p63_p1  ;;  %p1535_p0 = por %p179_p13, %p63_p1 }
  0x7e   : > { %s1792_s22 = scalar_select %p1526_p12, 1, 0 }
  0x7f   : > { %s1533_s23 = scalar_select %p48_p3, %s1286_s26, %s50_s13  }
  0x80   : > { %s1793_s9 = scalar_select %p1535_p0, 1, 0 }
  0x81   : > { %s301_s10 = sand.u32 1, %s1286_s26   ;;  %s814_s16 = sshll.u32 %s1294_s28, 7 }
  0x82   : > { %s813_s15 = sshll.u32 %s301_s10, 3  ;;  %s1545_s14 = scalar_lea.hbm %s1768_s0, %s814_s16 }
  0x83   : > { %s305_s18 = scalar_lea.vmem [#allocation2], %s813_s15  ;;  %p1549_p5 = pnand %p928_p2, %p1511_p4 }
  0x84   : > { %s313_s13 = sshll.u32 %s305_s18, 4  ;;  %s302_s1 = scalar_lea.sflag [#allocation3], %s301_s10  ;;  %s1553_s13 = int_to_ptr.vmem [resolvable:$true] %s313_s13 }
  0x85   : > { %s1118_s2 = scalar_lea.hbm %s1545_s14, 128  ;;  %p1120_p7 = pneg %p1549_p5 }
  0x86   : > { %p1119_p8 = scmp.ne.s32.totalorder %s1545_s14, %s1118_s2  ;;  %s1123_s19 = scalar_lea.hbm %s1768_s0, 256 }
  0x87   : > { %p1124_p4 = scmp.lt.u32.totalorder %s1545_s14, %s1768_s0  ;;  %p1125_p6 = scmp.lt.u32.totalorder %s1123_s19, %s1118_s2 }
  0x88   : > { %p1121_p9 = pnand %p1120_p7, %p1119_p8  ;;  %p1127_p10 = scmp.lt.u32.totalorder %s1118_s2, %s1545_s14 }
  0x89   : > { %p1126_p3 = por %p1125_p6, %p1124_p4 }
  0x8a   : > { %p1122_p1 = pneg %p1121_p9 }
  0x8b   : > { %p1128_p13 = por %p1127_p10, %p1126_p3 }
  0x8d   : > { %p1129_p2 = pnand %p1128_p13, %p1122_p1 }
  0x8f   : > { %1132 = shalt.err (!%p1129_p2)
}
  0x90   : > { %s1133_s10 = scalar_lea.vmem %s1553_s13, 128  ;;  %s1306_s18 = smov [#allocation2]  }
  0x91   : > { %p1134_p8 = scmp.ne.s32.totalorder %s1553_s13, %s1133_s10  ;;  %s1138_s16 = sshll.u32 %s1306_s18, 4  ;;  %s1139_s16 = int_to_ptr.vmem [resolvable:$false] %s1138_s16 }
  0x92   : > { %s1140_s15 = scalar_lea.vmem %s1139_s16, 256  ;;  %p1141_p12 = scmp.lt.s32.totalorder %s1553_s13, %s1139_s16 }
  0x93   : > { %p1136_p9 = pnand %p1134_p8, %p1120_p7  ;;  %p1142_p4 = scmp.lt.s32.totalorder %s1140_s15, %s1133_s10 }
  0x95   : > { %p1137_p0 = pneg %p1136_p9  ;;  %p1143_p6 = por %p1142_p4, %p1141_p12 }
  0x97   : > { %p1144_p3 = pnand %p1143_p6, %p1137_p0 }
  0x99   : > { %1147 = shalt.err (!%p1144_p3)
}
  0x9a   : > { %913 = dma.hbm_to_vmem [thread:$0]  (!%p1549_p5), %s1545_s14, 128, %s1553_s13, %s302_s1  }
  0x9b   : > { %p1795_p1 = scmp.ne.s32.totalorder %s1784_s8, 0 }
  0x9c   : > { %s1583_s2 = sand.u32 (!%p1795_p1), 1, %s1282_s25  }
  0x9d   : > { %322 = sbr.rel (%p1795_p1) target bundleno = 891 (0x37b), region = 40  ;;  %s816_s19 = sshll.u32 (!%p1795_p1), %s1583_s2, 3 }
  0x9e   : > { %s325_s12 = scalar_lea.sflag (!%p1795_p1), [#allocation3], %s1583_s2  ;;  %s328_s11 = scalar_lea.vmem (!%p1795_p1), [#allocation2], %s816_s19 }
  0xa4   : > { %1257 = dma.done.wait (%p1522_p11), %s325_s12, 128  }
  0xa5   : > { %1259 = vsyncadd (%p1522_p11), %s325_s12, 4294967168  ;;  %p1796_p12 = scmp.eq.s32.totalorder %s1397_s30, 0 }
  0xa7   : > { %1261 = dma.done.wait (%p1796_p12), [#allocation6], 32   ;;  %p1797_p0 = pmov %p1796_p12 }
  0xa9   : > { %1263 = vsyncadd (%p1797_p0), [#allocation6], 4294967264  ;;  %p1798_p5 = pmov %p1797_p0 }
  0xaa   : > { %p1799_p7 = pmov %p1797_p0 }
  0xab   : > { %1265 = dma.done.wait (%p1798_p5), [#allocation9], 528  }
  0xac   : > { %1267 = vsyncadd (%p1799_p7), [#allocation9], 4294966768  ;;  %vm388_vm0 = vcmask 261120   ;;  %v385_v0 = vld [vmem:[%s328_s11] sm:$0xff]  ;;  %v417_v7 = vld [vmem:[#allocation8] sm:$0xff]  ;;  %v1307_v10 = vmov 0.0|0.0  }
  0xad   : > { %v389_v1 = vsel %vm388_vm0, %v385_v0, 0.0  ;;  %v418_v8 = vld [vmem:[#allocation8 + $0x8] sm:$0xff]  ;;  %v419_v9 = vld [vmem:[#allocation8 + $0x10] sm:$0xff]  ;;  %867 = vmatprep.subr.bf16.mxu0 %v1307_v10  ;;  %v420_v12 = vld [vmem:[#allocation8 + $0x18] sm:$0xff]  ;;  %vm1308_vm1 = vmmov 0   ;;  %v1309_v13 = vmov 0.0  }
  0xae   : > { %390 = vadd.xlane.f32.xlu0 %v389_v1  ;;  %v868_v11 = vpack.c.bf16 %v418_v8, %v417_v7  ;;  %864 = vmatprep.mubr.msk.f32.mxu0 %vm1308_vm1, %v1309_v13  ;;  %v871_v14 = vpack.c.bf16 %v420_v12, %v419_v9  ;;  %v824_v19 = vld [vmem:[#allocation5] ss:$0 sm:$0xff]  ;;  %v825_v21 = vld [vmem:[#allocation7] ss:$0 sm:$0xff]  ;;  %v826_v24 = vld [vmem:[#allocation10] ss:$0 sm:$0xff] }
  0xaf   : > { %s1603_s1 = sshll.u32 %s1583_s2, 5  ;;  %vm502_vm2 = vcmask 64512   ;;  %s1310_s8 = smov 80  }
  0xb0   : > { %869 = vmatpush3.bf16.msra.mxu0 %v868_v11  ;;  %s1311_s21 = smov 96   ;;  %s1606_s20 = scalar_lea.vmem [#allocation11], %s1603_s1 }
  0xb1   : > { %870 = vmatprep.subr.bf16.mxu0 %v1307_v10  ;;  %s1312_s14 = smov 88   ;;  %s1313_s13 = smov 104  }
  0xb2   : > { %s1314_s10 = smov 72   ;;  %s1315_s18 = smov 64  }
  0xb3   : > { %s1316_s16 = smov 56   ;;  %s1317_s15 = smov 48  }
  0xb4   : > { %872 = vmatpush3.bf16.msra.mxu0 %v871_v14  ;;  %s1318_s19 = smov 120   ;;  %s1319_s12 = smov 112  }
  0xb5   : > { %s1320_s11 = smov 40   ;;  %p1800_p10 = scmp.ne.s32.totalorder %s1792_s22, 0 }
 0x13b   : > { %v391_v2 = vpop.xlane.xlu0 %390 }
 0x13c   : > { %v393_v3 = vmul.f32 0.03125, %v391_v2 }
 0x13e   : > { %v394_v4 = vsub.f32 %v385_v0, %v393_v3 }
 0x140   : > { %v395_v5 = vmul.f32 %v394_v4, %v394_v4 }
 0x142   : > { %v396_v6 = vsel %vm388_vm0, %v395_v5, 0.0 }
 0x143   : > { %397 = vadd.xlane.f32.xlu0 %v396_v6 }
 0x1d0   : > { %v398_v15 = vpop.xlane.xlu0 %397 }
 0x1d1   : > { %v399_v16 = vmul.f32 0.03125, %v398_v15 }
 0x1d3   : > { %v400_v17 = vadd.f32 1e-05, %v399_v16 }
 0x1d5   : > { %1004 = vrsqrt.f32 %v400_v17 }
 0x1df   : > { %v1005_v18 = vpop.eup %1004 }
 0x1e0   : > { %v402_v20 = vmul.f32 %v1005_v18, %v394_v4 }
 0x1e2   : > { %v409_v22 = vmul.f32 %v824_v19, %v402_v20 }
 0x1e4   : > { %v416_v23 = vadd.f32 %v825_v21, %v409_v22 }
 0x1e6   : > { %865 = vmatmul.mubr.msk.f32.vlgmr.msra.gmra.mrb[0].mxu0 %vm388_vm0, %v416_v23 }
 0x2b9   : > { %v497_v25 = vpop.f32.mrb[0].mxu0 }
 0x2ba   : > { %v498_v26 = vadd.f32 %v826_v24, %v497_v25  ;;  %v866_v27 = vpop.f32.mrb[1].mxu0 }
 0x2bc   : > { %534 = vrot.lane.b32.xlu0 %v498_v26, %s1310_s8  ;;  %505 = vrot.lane.b32.xlu1 %v498_v26, %s1311_s21  ;;  %v501_v28 = vmul.f32 0.35355338, %v498_v26  ;;  %s377_s8 = scalar_lea.vmem [#allocation12], %s1603_s1 }
 0x2bd   : > { %s601_s21 = sshll.u32 %s377_s8, 4  ;;  %s1617_s21 = int_to_ptr.vmem [resolvable:$true] %s601_s21 }
 0x2be   : > { %503 = vst.msk [vmem:[%s1606_s20] sm:$0xff] %vm502_vm2, %v501_v28 }
 0x2c0   : > { %519 = vrot.lane.b32.xlu1 %v498_v26, %s1312_s14  ;;  %544 = vrot.lane.b32.xlu0 %v501_v28, %s1313_s13  ;;  %s564_s14 = sand.u32 1, %s1397_s30   ;;  %s1615_s13 = sshll.u32 %s1290_s27, 9 }
 0x2c1   : > { %s1629_s27 = scalar_lea.sflag [#allocation13], %s564_s14  ;;  %s1148_s30 = scalar_lea.vmem %s1617_s21, 512 }
 0x2c2   : > { %p1149_p11 = scmp.ne.s32.totalorder %s1617_s21, %s1148_s30 }
 0x2c4   : > { %549 = vrot.lane.b32.xlu1 %v498_v26, %s1314_s10  ;;  %p1150_p13 = pnand %p1149_p11, %p1800_p10 }
 0x2c6   : > { %p1151_p2 = pneg %p1150_p13 }
 0x2c8   : > { %509 = vrot.lane.b32.xlu1 %v498_v26, %s1315_s18 }
 0x2cc   : > { %524 = vrot.lane.b32.xlu1 %v498_v26, %s1316_s16  ;;  %s1626_s16 = scalar_lea.hbm %s1774_s6, %s1615_s13 }
 0x2d0   : > { %539 = vrot.lane.b32.xlu1 %v498_v26, %s1317_s15  ;;  %s1321_s15 = smov [#allocation12]  }
 0x2d4   : > { %514 = vrot.lane.b32.xlu1 %v501_v28, %s1318_s19  ;;  %s1152_s19 = sshll.u32 %s1321_s15, 4  ;;  %s1153_s19 = int_to_ptr.vmem [resolvable:$false] %s1152_s19 }
 0x2d5   : > { %p1155_p8 = scmp.lt.s32.totalorder %s1617_s21, %s1153_s19 }
 0x2d8   : > { %529 = vrot.lane.b32.xlu1 %v501_v28, %s1319_s12  ;;  %s1154_s12 = scalar_lea.vmem %s1153_s19, 1024 }
 0x2d9   : > { %p1156_p9 = scmp.lt.s32.totalorder %s1154_s12, %s1148_s30 }
 0x2db   : > { %p1157_p4 = por %p1156_p9, %p1155_p8 }
 0x2dc   : > { %554 = vrot.lane.b32.xlu1 %v498_v26, %s1320_s11 }
 0x2dd   : > { %p1158_p6 = pnand %p1157_p4, %p1151_p2 }
 0x32e   : > { %v535_v29 = vpop.permute.xlu0 %534  ;;  %v506_v30 = vpop.permute.xlu1 %505 }
 0x32f   : > { %832 = vst.msk [vmem:[%s377_s8 + $0x10] sm:$0xff] %vm502_vm2, %v535_v29  ;;  %508 = vst.msk [vmem:[%s377_s8] sm:$0xff] %vm502_vm2, %v506_v30 }
 0x332   : > { %v520_v31 = vpop.permute.xlu1 %519  ;;  %v545_v32 = vpop.permute.xlu0 %544 }
 0x333   : > { %829 = vst.msk [vmem:[%s377_s8 + $0x8] sm:$0xff] %vm502_vm2, %v520_v31  ;;  %834 = vst.msk [vmem:[%s1606_s20 + $0x18] sm:$0xff] %vm502_vm2, %v545_v32 }
 0x336   : > { %v550_v33 = vpop.permute.xlu1 %549 }
 0x337   : > { %835 = vst.msk [vmem:[%s377_s8 + $0x18] sm:$0xff] %vm502_vm2, %v550_v33 }
 0x338   : > { %1161 = shalt.err (!%p1158_p6)
}
 0x339   : > { %s1162_s11 = scalar_lea.hbm %s1626_s16, 512  ;;  %s1166_s10 = scalar_lea.hbm %s1774_s6, 1024 }
 0x33a   : > { %p1163_p3 = scmp.ne.s32.totalorder %s1626_s16, %s1162_s11  ;;  %p1167_p0 = scmp.lt.u32.totalorder %s1626_s16, %s1774_s6 }
 0x33b   : > { %p1168_p5 = scmp.lt.u32.totalorder %s1166_s10, %s1162_s11  ;;  %p1170_p11 = scmp.lt.u32.totalorder %s1162_s11, %s1626_s16 }
 0x33c   : > { %p1164_p1 = pnand %p1163_p3, %p1800_p10 }
 0x33d   : > { %p1169_p7 = por %p1168_p5, %p1167_p0 }
 0x33e   : > { %p1165_p12 = pneg %p1164_p1 }
 0x33f   : > { %p1171_p13 = por %p1170_p11, %p1169_p7 }
 0x341   : > { %p1172_p2 = pnand %p1171_p13, %p1165_p12 }
 0x343   : > { %1175 = shalt.err (!%p1172_p2)
}
 0x344   : > { %s1780_s30 = smov 128   ;;  %s1323_s19 = smov 8   ;;  %v510_v34 = vpop.permute.xlu1 %509 }
 0x345   : > { %892 = dma.vmem_to_hbm [thread:$0]  (%p1800_p10), %s1617_s21, 512, %s1626_s16, %s1629_s27, %s1780_s30, %s1780_s30, %s1323_s19  }
 0x346   : > { %s1657_s12 = scalar_lea.vmem [#allocation14], %s1603_s1  ;;  %s584_s11 = sshll.u32 %s1606_s20, 4  ;;  %s1668_s11 = int_to_ptr.vmem [resolvable:$true] %s584_s11 }
 0x347   : > { %512 = vst.msk [vmem:[%s1657_s12] sm:$0xff] %vm502_vm2, %v510_v34  ;;  %s1674_s16 = scalar_lea.hbm %s1773_s5, %s1615_s13  ;;  %s560_s14 = scalar_lea.sflag [#allocation4], %s1583_s2 }
 0x348   : > { %v525_v35 = vpop.permute.xlu1 %524  ;;  %s1176_s10 = scalar_lea.vmem %s1668_s11, 512  ;;  %s1324_s18 = smov [#allocation11]  }
 0x349   : > { %830 = vst.msk [vmem:[%s1657_s12 + $0x8] sm:$0xff] %vm502_vm2, %v525_v35  ;;  %p1177_p8 = scmp.ne.s32.totalorder %s1668_s11, %s1176_s10  ;;  %s1180_s15 = sshll.u32 %s1324_s18, 4  ;;  %s1181_s15 = int_to_ptr.vmem [resolvable:$false] %s1180_s15 }
 0x34a   : > { %s1182_s30 = scalar_lea.vmem %s1181_s15, 1024  ;;  %p1183_p6 = scmp.lt.s32.totalorder %s1668_s11, %s1181_s15 }
 0x34b   : > { %p1178_p9 = pnand %p1177_p8, %p1800_p10  ;;  %p1184_p3 = scmp.lt.s32.totalorder %s1182_s30, %s1176_s10 }
 0x34c   : > { %v540_v36 = vpop.permute.xlu1 %539 }
 0x34d   : > { %833 = vst.msk [vmem:[%s1657_s12 + $0x10] sm:$0xff] %vm502_vm2, %v540_v36  ;;  %p1179_p4 = pneg %p1178_p9  ;;  %p1185_p1 = por %p1184_p3, %p1183_p6 }
 0x34f   : > { %p1186_p12 = pnand %p1185_p1, %p1179_p4 }
 0x350   : > { %v515_v37 = vpop.permute.xlu1 %514 }
 0x351   : > { %828 = vst.msk [vmem:[%s1606_s20 + $0x8] sm:$0xff] %vm502_vm2, %v515_v37 }
 0x354   : > { %v530_v38 = vpop.permute.xlu1 %529 }
 0x355   : > { %831 = vst.msk [vmem:[%s1606_s20 + $0x10] sm:$0xff] %vm502_vm2, %v530_v38 }
 0x356   : > { %1189 = shalt.err (!%p1186_p12)
}
 0x357   : > { %s1190_s20 = scalar_lea.hbm %s1674_s16, 512  ;;  %s1194_s18 = scalar_lea.hbm %s1773_s5, 1024 }
 0x358   : > { %p1191_p0 = scmp.ne.s32.totalorder %s1674_s16, %s1190_s20  ;;  %p1195_p11 = scmp.lt.u32.totalorder %s1674_s16, %s1773_s5 }
 0x359   : > { %p1196_p13 = scmp.lt.u32.totalorder %s1194_s18, %s1190_s20  ;;  %p1198_p8 = scmp.lt.u32.totalorder %s1190_s20, %s1674_s16 }
 0x35a   : > { %p1192_p5 = pnand %p1191_p0, %p1800_p10 }
 0x35b   : > { %p1197_p2 = por %p1196_p13, %p1195_p11 }
 0x35c   : > { %p1193_p7 = pneg %p1192_p5 }
 0x35d   : > { %p1199_p9 = por %p1198_p8, %p1197_p2 }
 0x35f   : > { %p1200_p4 = pnand %p1199_p9, %p1193_p7 }
 0x361   : > { %1203 = shalt.err (!%p1200_p4)
}
 0x362   : > { %s1801_s30 = smov 128   ;;  %s1802_s8 = sshll.u32 %s1657_s12, 4  ;;  %v555_v39 = vpop.permute.xlu1 %554  ;;  %s1708_s8 = int_to_ptr.vmem [resolvable:$true] %s1802_s8 }
 0x363   : > { %891 = dma.vmem_to_hbm [thread:$0]  (%p1800_p10), %s1668_s11, 512, %s1674_s16, %s560_s14, %s1801_s30, %s1801_s30, %s1323_s19  }
 0x364   : > { %s1714_s1 = scalar_lea.hbm %s1775_s7, %s1615_s13  ;;  %836 = vst.msk [vmem:[%s1657_s12 + $0x18] sm:$0xff] %vm502_vm2, %v555_v39  ;;  %s1204_s2 = scalar_lea.vmem %s1708_s8, 512 }
 0x365   : > { %p1205_p6 = scmp.ne.s32.totalorder %s1708_s8, %s1204_s2  ;;  %s1325_s11 = smov [#allocation14]  }
 0x366   : > { %s1208_s16 = sshll.u32 %s1325_s11, 4  ;;  %s1209_s16 = int_to_ptr.vmem [resolvable:$false] %s1208_s16 }
 0x367   : > { %p1206_p3 = pnand %p1205_p6, %p1800_p10  ;;  %s1210_s14 = scalar_lea.vmem %s1209_s16, 1024 }
 0x368   : > { %p1211_p12 = scmp.lt.s32.totalorder %s1708_s8, %s1209_s16  ;;  %p1212_p0 = scmp.lt.s32.totalorder %s1210_s14, %s1204_s2 }
 0x369   : > { %p1207_p1 = pneg %p1206_p3 }
 0x36a   : > { %p1213_p5 = por %p1212_p0, %p1211_p12 }
 0x36c   : > { %p1214_p7 = pnand %p1213_p5, %p1207_p1 }
 0x36e   : > { %1217 = shalt.err (!%p1214_p7)
}
 0x36f   : > { %s1218_s13 = scalar_lea.hbm %s1714_s1, 512  ;;  %s1222_s18 = scalar_lea.hbm %s1775_s7, 1024 }
 0x370   : > { %p1219_p11 = scmp.ne.s32.totalorder %s1714_s1, %s1218_s13  ;;  %p1223_p8 = scmp.lt.u32.totalorder %s1714_s1, %s1775_s7 }
 0x371   : > { %p1224_p9 = scmp.lt.u32.totalorder %s1222_s18, %s1218_s13  ;;  %p1226_p6 = scmp.lt.u32.totalorder %s1218_s13, %s1714_s1 }
 0x372   : > { %p1220_p13 = pnand %p1219_p11, %p1800_p10 }
 0x373   : > { %p1225_p4 = por %p1224_p9, %p1223_p8 }
 0x374   : > { %p1221_p2 = pneg %p1220_p13 }
 0x375   : > { %p1227_p3 = por %p1226_p6, %p1225_p4 }
 0x377   : > { %p1228_p1 = pnand %p1227_p3, %p1221_p2 }
 0x379   : > { %1231 = shalt.err (!%p1228_p1)
}
 0x37a   : > { %893 = dma.vmem_to_hbm [thread:$0]  (%p1800_p10), %s1708_s8, 512, %s1714_s1, %s1629_s27, %s1801_s30, %s1801_s30, %s1323_s19  }
 0x37b PF: > { %s633_s20 = sand.u32 1, %s1278_s24   ;;  %p1803_p12 = scmp.ne.s32.totalorder %s1793_s9, 0 }
 0x37c   : > { %p1804_p0 = scmp.ge.s32.totalorder %s1298_s29, 2  ;;  %s634_s2 = scalar_lea.sflag [#allocation4], %s633_s20 }
 0x37e   : > { %p915_p5 = pnand %p1804_p0, %p1803_p12 }
 0x380   : > { %1269 = dma.done.wait (!%p915_p5), %s634_s2, 512  }
 0x381   : > { %1271 = vsyncadd (!%p915_p5), %s634_s2, 4294966784  ;;  %s1805_s22 = sadd.s32 4294967294, %s1298_s29  }
 0x382   : > { %s642_s11 = sand.u32 1, %s1805_s22  }
 0x383   : > { %s643_s16 = scalar_lea.sflag [#allocation13], %s642_s11 }
 0x384   : > { %1273 = dma.done.wait (!%p915_p5), %s643_s16, 1024  }
 0x385   : > { %1275 = vsyncadd (!%p915_p5), %s643_s16, 4294966272  ;;  %s29_s29 = sadd.s32 1, %s1298_s29   ;;  %s1806_s24 = smov %s1282_s25 }
 0x386   : > { %p26_p10 = scmp.ge.s32.totalorder %s29_s29, 4   ;;  %s1807_s25 = smov %s1286_s26 }
 0x387   : > { %s1808_s26 = smov %s1533_s23  ;;  %s1809_s27 = smov %s1294_s28 }
 0x388   : > { %s1810_s28 = smov %s1812_s17  ;;  %28 = sbr.rel (!%p26_p10) target bundleno = 13 (0xd), region = 142 }
 0x38f   :  { %657 = vsyncpa [#allocation3], 1 }
 0x390   :  { %659 = vsyncpa [#allocation3 + $0x1], 1 }
 0x391   :  { %660 = vsyncpa [#allocation6], 1 }
 0x392   :  { %661 = vsyncpa [#allocation9], 1 }
 0x393   :  { %662 = vsyncpa [#allocation4], 1 }
 0x394   :  { %664 = vsyncpa [#allocation4 + $0x1], 1 }
 0x395   :  { %665 = vsyncpa [#allocation13], 1 }
 0x396   :  { %667 = vsyncpa [#allocation13 + $0x1], 1 }

</bundles_post_ra>
